<compile_context>
chip_gen: v6e
topology: v6e:2x2x1
jax: 0.10.0
libtpu: 0.0.40
codegen_flags: <defaults>
</compile_context>

<pallas_src>
import functools

import jax
import jax.numpy as jnp
from jax import lax
from jax.experimental import pallas as pl
from jax.experimental.pallas import tpu as pltpu


def _adaptive_point_norm_kernel(x_ref, s_ref, w_ref, o_ref, s_aug_ref, *,
                                style_dim, tc):
    # x_ref:     (TC, N)      input channel tile for one batch element
    # s_ref:     (S, N)       style code for this batch element (resident across c tiles)
    # w_ref:     (2*TC, S+1)  fused [gamma_tile; beta_tile] conv weight, bias in last col
    # o_ref:     (TC, N)      output channel tile
    # s_aug_ref: (S+1, N)     VMEM scratch: style with a constant-ones row appended
    n = x_ref.shape[-1]

    # Augmented style operand so the conv bias rides the MXU contraction (removes the
    # full-tile VPU bias-add pass).  Copy cost is only S+1 rows per grid step.
    s_aug_ref[0:style_dim, :] = s_ref[...]
    s_aug_ref[style_dim:style_dim + 1, :] = jnp.ones((1, n), dtype=s_aug_ref.dtype)

    # Fused 1x1 Conv1d: one MXU dot produces this tile's gamma and beta rows (f32 acc),
    # bias included via the ones row.  Operands stay in the input dtype.
    gb = jnp.dot(w_ref[...], s_aug_ref[...], preferred_element_type=jnp.float32)
    gamma = gb[:tc, :]
    beta = gb[tc:, :]

    # InstanceNorm1d: per-(batch, channel) stats over the point axis, biased variance,
    # eps = 1e-5.  Two-pass (centered) form matches PyTorch numerics.
    x = x_ref[...].astype(jnp.float32)
    inv_n = jnp.float32(1.0 / n)
    mean = jnp.sum(x, axis=-1, keepdims=True) * inv_n
    xc = x - mean
    var = jnp.sum(xc * xc, axis=-1, keepdims=True) * inv_n
    normed = xc * lax.rsqrt(var + jnp.float32(1e-5))

    # TODO(synk): for bf16 I/O on v6e/v7x this final affine could run in bf16 to halve
    # vld/vst traffic of the last pass; kept in f32 for v5e compatibility.
    o_ref[...] = (gamma * normed + beta).astype(o_ref.dtype)


def _vmem_capacity_bytes():
    """Best-effort VMEM capacity query; falls back to the smallest (v7x) size."""
    try:
        cap = getattr(pltpu.get_tpu_info(), "vmem_capacity_bytes", None)
        if cap:
            return int(cap)
    except Exception:
        pass
    return 64 << 20


def _estimate_step_vmem(tc, S, N, x_isz, s_isz, w_isz):
    """Real per-step VMEM footprint: double-buffered x/out blocks, style block +
    augmented-style scratch, weight block, and the f32 compute temporaries
    (gb is 2x the tile; plus the f32 upcast / centered / normalized tiles)."""
    io = 4 * tc * N * x_isz                         # x (2 bufs) + out (2 bufs)
    style = 2 * S * N * s_isz + (S + 1) * N * s_isz  # style dbuf + ones-augmented scratch
    w = 4 * tc * (S + 1) * w_isz                    # (2*tc, S+1), double-buffered
    temps = 5 * tc * N * 4                          # gb(2x) + x_f32 + xc + normed, f32
    return io + style + w + temps


def _pick_channel_tile(B, C, S, N, x_isz, s_isz, w_isz, budget):
    """Largest channel tile (multiple of 8, divisor of C) whose per-step footprint fits
    `budget`; ensures >= 2 grid steps when B == 1 (v7x has two TensorCores)."""
    if C % 8 != 0:
        return C                                    # irregular C: single full-C tile
    cands = [d for d in range(C, 7, -8) if C % d == 0]
    tc = cands[-1]                                  # = 8, worst-case fallback
    for d in cands:
        if _estimate_step_vmem(d, S, N, x_isz, s_isz, w_isz) <= budget:
            tc = d
            break
    if B == 1 and tc == C:
        # Split so the "parallel" grid has >= 2 steps (harmless extra step on 1-TC chips).
        for d in cands:
            if d < tc:
                tc = d
                break
    return tc


def adaptive_point_norm(x, style, weight, bias, *, channel_tile=None):
    """x: (B, C, N), style: (B, S, N), weight: (2C, S), bias: (2C,) -> (B, C, N)."""
    B, C, N = x.shape
    S = style.shape[1]
    assert style.shape == (B, S, N)
    assert weight.shape == (2 * C, S)
    assert bias.shape == (2 * C,)

    x_isz = jnp.dtype(x.dtype).itemsize
    s_isz = jnp.dtype(style.dtype).itemsize
    w_isz = jnp.dtype(style.dtype).itemsize        # weight is cast to the style dtype below

    # VMEM budget: ~75% of the chip's VMEM (v7x: 48 MiB, v5e/v6e: 96 MiB).  The limit is
    # raised explicitly so the scoped default (16/32 MiB) never forces tiny tiles or the
    # loss of double-buffering.
    vmem_limit = min(_vmem_capacity_bytes() * 3 // 4, 96 << 20)

    if channel_tile is not None:
        tc = channel_tile
        assert C % tc == 0, "channel_tile must divide the channel count"
        assert tc % 8 == 0 or tc == C, "channel_tile must be a multiple of 8 (or == C)"
    else:
        tc = _pick_channel_tile(B, C, S, N, x_isz, s_isz, w_isz, budget=vmem_limit)
    num_tiles = C // tc

    # Conv params, rearranged so each channel tile's gamma and beta rows are contiguous
    # ([g_tile0; b_tile0; g_tile1; b_tile1; ...]) and the bias becomes one extra weight
    # column contracted against the constant-ones style row inside the kernel.
    w_aug = jnp.concatenate([weight, bias[:, None]], axis=1).astype(style.dtype)
    w2 = w_aug.reshape(2, num_tiles, tc, S + 1).transpose(1, 0, 2, 3).reshape(
        num_tiles * 2 * tc, S + 1)

    kernel = functools.partial(_adaptive_point_norm_kernel, style_dim=S, tc=tc)

    # NOTE: keep the channel axis as the INNER grid axis and the style index_map
    # independent of it -> the (S, N) style block stays VMEM-resident across channel tiles.
    return pl.pallas_call(
        kernel,
        out_shape=jax.ShapeDtypeStruct((B, C, N), x.dtype),
        grid_spec=pltpu.PrefetchScalarGridSpec(
            num_scalar_prefetch=0,
            grid=(B, num_tiles),
            in_specs=[
                pl.BlockSpec((None, tc, N), lambda b, c: (b, c, 0)),   # x channel tile
                pl.BlockSpec((None, S, N), lambda b, c: (b, 0, 0)),    # style (resident)
                pl.BlockSpec((2 * tc, S + 1), lambda b, c: (c, 0)),    # fused weight+bias
            ],
            out_specs=pl.BlockSpec((None, tc, N), lambda b, c: (b, c, 0)),
            scratch_shapes=[pltpu.VMEM((S + 1, N), style.dtype)],
        ),
        compiler_params=pltpu.CompilerParams(
            dimension_semantics=("parallel", "parallel"),
            vmem_limit_bytes=vmem_limit),
    )(x, style, w2)


def adaptive_point_norm_ref(x, style, weight, bias):
    """Pure-JAX reference matching the PyTorch forward."""
    B, C, N = x.shape
    s = jnp.einsum("os,bsn->bon", weight, style) + bias[None, :, None]  # (B, 2C, N)
    gamma, beta = s[:, :C, :], s[:, C:, :]
    mean = jnp.mean(x, axis=-1, keepdims=True)
    var = jnp.mean((x - mean) ** 2, axis=-1, keepdims=True)
    normed = (x - mean) / jnp.sqrt(var + 1e-5)
    return gamma * normed + beta


def _make_inputs(key, B, C, S, N):
    kx, ks, kw = jax.random.split(key, 3)
    x = jax.random.normal(kx, (B, C, N), dtype=jnp.float32)
    style = jax.random.normal(ks, (B, S, N), dtype=jnp.float32)
    # Mirrors the module's __init__: weight ~ N(0,1); bias[:C] = 1; bias[C:] = 0.
    weight = jax.random.normal(kw, (2 * C, S), dtype=jnp.float32)
    bias = jnp.concatenate([jnp.ones((C,), jnp.float32),
                            jnp.zeros((C,), jnp.float32)])
    return x, style, weight, bias


if __name__ == "__main__":
    key = jax.random.PRNGKey(0)
    k1, k2, k3 = jax.random.split(key, 3)

    # Case 1: small baseline (B=2, C=4, S=8, N=128) — single channel tile, lane-exact N.
    x, style, weight, bias = _make_inputs(k1, B=2, C=4, S=8, N=128)
    out = jax.block_until_ready(adaptive_point_norm(x, style, weight, bias))
    ref = adaptive_point_norm_ref(x, style, weight, bias)
    assert out.shape == x.shape
    assert jnp.allclose(out, ref, atol=1e-4, rtol=1e-4), "case 1: mismatch vs reference"

    # Case 2: multi channel-tile + ragged N (B=2, C=16, S=8, N=200, TC=8) — exercises the
    # fused per-tile weight/bias layout and the no-padding masked-tail store path.
    x2, style2, weight2, bias2 = _make_inputs(k2, B=2, C=16, S=8, N=200)
    out2 = jax.block_until_ready(
        adaptive_point_norm(x2, style2, weight2, bias2, channel_tile=8))
    ref2 = adaptive_point_norm_ref(x2, style2, weight2, bias2)
    assert out2.shape == x2.shape
    assert jnp.allclose(out2, ref2, atol=1e-4, rtol=1e-4), "case 2: mismatch vs reference"

    # Case 3: B=1 path — the tile picker forces >= 2 grid steps (v7x dual-TensorCore).
    x3, style3, weight3, bias3 = _make_inputs(k3, B=1, C=16, S=8, N=160)
    out3 = jax.block_until_ready(adaptive_point_norm(x3, style3, weight3, bias3))
    ref3 = adaptive_point_norm_ref(x3, style3, weight3, bias3)
    assert out3.shape == x3.shape
    assert jnp.allclose(out3, ref3, atol=1e-4, rtol=1e-4), "case 3: mismatch vs reference"

    print("KERNEL_OK")
</pallas_src>

<mosaic_0001>
module attributes {stable_mosaic.version = 11 : i64} {
  func.func @_adaptive_point_norm_kernel(%arg0: i32, %arg1: i32, %arg2: memref<1x4x128xf32, #tpu.memory_space<vmem>>, %arg3: memref<1x8x128xf32, #tpu.memory_space<vmem>>, %arg4: memref<8x9xf32, #tpu.memory_space<vmem>>, %arg5: memref<1x4x128xf32, #tpu.memory_space<vmem>>, %arg6: memref<9x128xf32, #tpu.memory_space<vmem>>) attributes {dimension_semantics = [#tpu.dimension_semantics<parallel>, #tpu.dimension_semantics<parallel>], iteration_bounds = array<i64: 2, 1>, scalar_prefetch = 0 : i64, scratch_operands = 1 : i64, tpu.core_type = #tpu.core_type<tc>, window_params = [{transform_indices = @transform_0, window_bounds = array<i64: 1, 4, 128>}, {transform_indices = @transform_1, window_bounds = array<i64: 1, 8, 128>}, {transform_indices = @transform_2, window_bounds = array<i64: 8, 9>}, {transform_indices = @transform_3, window_bounds = array<i64: 1, 4, 128>}]} {
    %c0 = arith.constant 0 : index
    %c0_0 = arith.constant 0 : index
    %c0_1 = arith.constant 0 : index
    %0 = vector.load %arg3[%c0, %c0_0, %c0_1] : memref<1x8x128xf32, #tpu.memory_space<vmem>>, vector<1x8x128xf32>
    %1 = vector.shape_cast %0 : vector<1x8x128xf32> to vector<8x128xf32>
    %c0_2 = arith.constant 0 : index
    %c0_3 = arith.constant 0 : index
    %2 = vector.load %arg6[%c0_2, %c0_3] : memref<9x128xf32, #tpu.memory_space<vmem>>, vector<8x128xf32>
    tpu.vector_store %arg6[%c0_2, %c0_3], %1 {strides = array<i32>} : memref<9x128xf32, #tpu.memory_space<vmem>>, vector<8x128xf32>,
    %cst = arith.constant 1.000000e+00 : f32
    %3 = vector.broadcast %cst : f32 to vector<1x128xf32>
    %c8 = arith.constant 8 : index
    %c0_4 = arith.constant 0 : index
    %4 = vector.load %arg6[%c8, %c0_4] : memref<9x128xf32, #tpu.memory_space<vmem>>, vector<1x128xf32>
    tpu.vector_store %arg6[%c8, %c0_4], %3 {strides = array<i32>} : memref<9x128xf32, #tpu.memory_space<vmem>>, vector<1x128xf32>,
    %c0_5 = arith.constant 0 : index
    %c0_6 = arith.constant 0 : index
    %5 = vector.load %arg4[%c0_5, %c0_6] : memref<8x9xf32, #tpu.memory_space<vmem>>, vector<8x9xf32>
    %c0_7 = arith.constant 0 : index
    %c0_8 = arith.constant 0 : index
    %6 = vector.load %arg6[%c0_7, %c0_8] : memref<9x128xf32, #tpu.memory_space<vmem>>, vector<9x128xf32>
    %cst_9 = arith.constant dense<0.000000e+00> : vector<8x128xf32>
    %7 = tpu.matmul %5, %6, %cst_9 {dimension_numbers = #tpu.dot_dimension_numbers<[1], [0], [0], [1], [0, 0, 1, 1], [], []>} : vector<8x9xf32>, vector<9x128xf32>, vector<8x128xf32> -> vector<8x128xf32>
    %8 = vector.extract_strided_slice %7 {offsets = [0, 0], sizes = [4, 128], strides = [1, 1]} : vector<8x128xf32> to vector<4x128xf32>
    %9 = vector.extract_strided_slice %7 {offsets = [4, 0], sizes = [4, 128], strides = [1, 1]} : vector<8x128xf32> to vector<4x128xf32>
    %c0_10 = arith.constant 0 : index
    %c0_11 = arith.constant 0 : index
    %c0_12 = arith.constant 0 : index
    %10 = vector.load %arg2[%c0_10, %c0_11, %c0_12] : memref<1x4x128xf32, #tpu.memory_space<vmem>>, vector<1x4x128xf32>
    %11 = vector.shape_cast %10 : vector<1x4x128xf32> to vector<4x128xf32>
    %cst_13 = arith.constant dense<0.000000e+00> : vector<4xf32>
    %12 = vector.multi_reduction <add>, %11, %cst_13 [1] : vector<4x128xf32> to vector<4xf32>
    %13 = vector.shape_cast %12 : vector<4xf32> to vector<4x1xf32>
    %cst_14 = arith.constant 7.812500e-03 : f32
    %14 = vector.broadcast %cst_14 : f32 to vector<4x1xf32>
    %15 = arith.mulf %13, %14 : vector<4x1xf32>
    %16 = vector.broadcast %15 : vector<4x1xf32> to vector<4x128xf32>
    %17 = arith.subf %11, %16 : vector<4x128xf32>
    %18 = arith.mulf %17, %17 : vector<4x128xf32>
    %cst_15 = arith.constant dense<0.000000e+00> : vector<4xf32>
    %19 = vector.multi_reduction <add>, %18, %cst_15 [1] : vector<4x128xf32> to vector<4xf32>
    %20 = vector.shape_cast %19 : vector<4xf32> to vector<4x1xf32>
    %cst_16 = arith.constant 7.812500e-03 : f32
    %21 = vector.broadcast %cst_16 : f32 to vector<4x1xf32>
    %22 = arith.mulf %20, %21 : vector<4x1xf32>
    %cst_17 = arith.constant 9.99999974E-6 : f32
    %23 = vector.broadcast %cst_17 : f32 to vector<4x1xf32>
    %24 = arith.addf %22, %23 : vector<4x1xf32>
    %25 = math.rsqrt %24 : vector<4x1xf32>
    %26 = vector.broadcast %25 : vector<4x1xf32> to vector<4x128xf32>
    %27 = arith.mulf %17, %26 : vector<4x128xf32>
    %28 = arith.mulf %8, %27 : vector<4x128xf32>
    %29 = arith.addf %28, %9 : vector<4x128xf32>
    %c0_18 = arith.constant 0 : index
    %c0_19 = arith.constant 0 : index
    %c0_20 = arith.constant 0 : index
    %30 = vector.load %arg5[%c0_18, %c0_19, %c0_20] : memref<1x4x128xf32, #tpu.memory_space<vmem>>, vector<1x4x128xf32>
    %31 = vector.shape_cast %30 : vector<1x4x128xf32> to vector<4x128xf32>
    %32 = vector.shape_cast %29 : vector<4x128xf32> to vector<1x4x128xf32>
    tpu.vector_store %arg5[%c0_18, %c0_19, %c0_20], %32 {strides = array<i32>} : memref<1x4x128xf32, #tpu.memory_space<vmem>>, vector<1x4x128xf32>,
    return
  }
  func.func @transform_0(%arg0: i32, %arg1: i32) -> (i32, i32, i32) {
    %c0_i32 = arith.constant 0 : i32
    %c0_i32_0 = arith.constant 0 : i32
    return %arg0, %arg1, %c0_i32 : i32, i32, i32
  }
  func.func @transform_1(%arg0: i32, %arg1: i32) -> (i32, i32, i32) {
    %c0_i32 = arith.constant 0 : i32
    %c0_i32_0 = arith.constant 0 : i32
    %c0_i32_1 = arith.constant 0 : i32
    return %arg0, %c0_i32, %c0_i32_0 : i32, i32, i32
  }
  func.func @transform_2(%arg0: i32, %arg1: i32) -> (i32, i32) {
    %c0_i32 = arith.constant 0 : i32
    %c0_i32_0 = arith.constant 0 : i32
    return %arg1, %c0_i32 : i32, i32
  }
  func.func @transform_3(%arg0: i32, %arg1: i32) -> (i32, i32, i32) {
    %c0_i32 = arith.constant 0 : i32
    %c0_i32_0 = arith.constant 0 : i32
    return %arg0, %arg1, %c0_i32 : i32, i32, i32
  }
}

</mosaic_0001>

<bundles_post_ra>
// kernel: tpu_custom_call.1
= control target key start
LH: loop header
LB: loop body
LE: loop exit
PB: predicated region body
PF: predicated region fallthrough
CT: control target
= control target key end

     0   :  { %s1012_s0 = inlined_call_operand.hbm [shape: f32[2,4,128], index: 0, kind: input, shape index: {}]   ;;  %s1013_s1 = inlined_call_operand.hbm [shape: f32[2,8,128], index: 1, kind: input, shape index: {}]   ;;  %s1014_s2 = inlined_call_operand.hbm [shape: f32[8,9], index: 2, kind: input, shape index: {}]   ;;  %s1015_s3 = inlined_call_operand.hbm [shape: f32[2,4,128], index: 3, kind: output, shape index: {}]  }
   0x1   :  { %1021 = sst [smem:[#allocation15_spill]] %s1012_s0 }
   0x2   :  { %1022 = sst [smem:[#allocation16_spill]] %s1014_s2 }
   0x3   :  { %8 = vsyncpa [#allocation4], 0 }
   0x4   :  { %10 = vsyncpa [#allocation4 + $0x1], 0 }
   0x5   :  { %11 = vsyncpa [#allocation7], 0 }
   0x6   :  { %13 = vsyncpa [#allocation7 + $0x1], 0 }
   0x7   :  { %14 = vsyncpa [#allocation5], 0 }
   0x8   :  { %16 = vsyncpa [#allocation5 + $0x1], 0  ;;  %s805_s12 = smov 0   ;;  %s807_s13 = smov 0  }
   0x9   :  { %s809_s14 = smov 0   ;;  %s811_s15 = smov 0  }
   0xa   :  { %s813_s16 = smov 0   ;;  %s815_s17 = smov 0  }
   0xb LB: > { %s836_s18 = sadd.s32 4294967295, %s776_s17   ;;  %s494_s19 = sadd.s32 4294967294, %s776_s17   ;;  %s776_s17 = sphi %s815_s17, %s22_s17   ;;  %s772_s16 = sphi %s813_s16, %s1046_s16   ;;  %s768_s15 = sphi %s811_s15, %s1045_s15   ;;  %s764_s14 = sphi %s809_s14, %s1044_s14   ;;  %s760_s13 = sphi %s807_s13, %s1043_s13   ;;  %s756_s12 = sphi %s805_s12, %s1042_s12  }
   0xc   : > { %s43_s20 = sadd.s32 1, %s764_s14  ;;  %p50_p0 = scmp.ne.s32.totalorder %s764_s14, %s760_s13 }
   0xd   : > { %p56_p1 = scmp.ne.s32.totalorder %s760_s13, %s756_s12  ;;  %p1016_p2 = scmp.eq.s32.totalorder %s836_s18, 0 }
   0xe   : > { %p134_p3 = scmp.eq.s32.totalorder %s836_s18, 1  ;;  %p140_p4 = scmp.eq.s32.totalorder %s494_s19, 1 }
   0xf   : > { %p848_p5 = por %p1016_p2, %p56_p1  ;;  %p495_p6 = scmp.ge.s32.totalorder %s776_s17, 1 }
  0x10   : > { %p856_p7 = por %p134_p3, %p50_p0  ;;  %p860_p8 = por %p140_p4, %p56_p1 }
  0x11   : > { %s1023_s21 = scalar_select %p848_p5, 1, 0 }
  0x12   : > { %s1024_s22 = scalar_select %p856_p7, 1, 0 }
  0x13   : > { %s1025_s23 = scalar_select %p860_p8, 1, 0 }
  0x14   : > { %p147_p9 = scmp.lt.s32.totalorder %s776_s17, 3  ;;  %s778_s25 = smov [#allocation8]  }
  0x15   : > { %s162_s26 = sshll.u32 %s778_s25, 4  ;;  %s34_s27 = sadd.s32 1, %s772_s16  ;;  %s163_s26 = int_to_ptr.vmem [resolvable:$true] %s162_s26 }
  0x16   : > { %p866_p11 = pnand %p495_p6, %p147_p9  ;;  %p51_p13 = scmp.eq.s32.totalorder %s776_s17, 0 }
  0x17   : > { %p880_p1 = scmp.ge.s32.totalorder %s34_s27, 2  ;;  %p549_p6 = scmp.lt.s32.totalorder %s776_s17, 2 }
  0x18   : > { %s1026_s24 = scalar_select %p866_p11, 1, 0 }
  0x19   : > { %p533_p12 = pneg %p866_p11  ;;  %p887_p4 = por %p51_p13, %p50_p0 }
  0x1a   : > { %s893_s4 = sand.u32 1, %s764_s14   ;;  %s617_s5 = scalar_lea.vmem %s163_s26, 128 }
  0x1b   : > { %p876_p3 = pnand %p533_p12, %p1016_p2  ;;  %p618_p12 = scmp.ne.s32.totalorder %s163_s26, %s617_s5 }
  0x1c   : > { %p625_p8 = scmp.lt.s32.totalorder %s163_s26, %s163_s26  ;;  %p626_p7 = scmp.lt.s32.totalorder %s617_s5, %s617_s5 }
  0x1d   : > { %p608_p9 = pneg %p876_p3 }
  0x1e   : > { %p627_p5 = por %p626_p7, %p625_p8 }
  0x1f   : > { %p620_p10 = pnand %p618_p12, %p608_p9 }
  0x21   : > { %p621_p2 = pneg %p620_p10 }
  0x23   : > { %p628_p11 = pnand %p627_p5, %p621_p2 }
  0x25   : > { %631 = shalt.err (!%p628_p11)
}
  0x26   : > { %s1030_s2 = sld [smem:[#allocation16_spill]]  ;;  %s1048_s27 = smov (%p880_p1, %s34_s27), 0 }
  0x27   : > { %1031 = sst [smem:[#allocation14_spill]] %s1048_s27  ;;  %s498_s8 = sshll.u32 %s893_s4, 2 }
  0x28   : > { %s38_s9 = ssub.s32 %s772_s16, %s1048_s27  ;;  %s499_s10 = sshll.u32 %s772_s16, 6 }
  0x29   : > { %p41_p0 = scmp.eq.s32.totalorder %s38_s9, 0  ;;  %s1032_s0 = sld [smem:[#allocation15_spill]] }
  0x2a   : > { %s177_s28 = scalar_lea.vmem [#allocation3], %s498_s8  ;;  %p922_p2 = pnand %p549_p6, %p887_p4 }
  0x2b   : > { %s185_s5 = sshll.u32 %s177_s28, 4  ;;  %s192_s29 = sand.u32 1, %s776_s17   ;;  %s186_s5 = int_to_ptr.vmem [resolvable:$true] %s185_s5 }
  0x2c   : > { %536 = dma.hbm_to_vmem [thread:$0]  (!%p876_p3), %s1030_s2, 128, %s163_s26, [#allocation7]  }
  0x2d   : > { %s916_s6 = scalar_select %p41_p0, %s764_s14, %s43_s20  }
  0x2e   : > { %s500_s7 = sshll.u32 %s893_s4, 3  ;;  %s174_s9 = scalar_lea.sflag [#allocation4], %s893_s4 }
  0x2f   : > { %s183_s25 = scalar_lea.hbm %s1032_s0, %s499_s10  ;;  %p634_p5 = pneg %p922_p2 }
  0x30   : > { %s645_s10 = scalar_lea.vmem %s186_s5, 64  ;;  %s779_s20 = smov [#allocation3]  }
  0x31   : > { %p646_p7 = scmp.ne.s32.totalorder %s186_s5, %s645_s10  ;;  %s650_s30 = sshll.u32 %s779_s20, 4  ;;  %s651_s30 = int_to_ptr.vmem [resolvable:$false] %s650_s30 }
  0x32   : > { %s652_s8 = scalar_lea.vmem %s651_s30, 128  ;;  %p653_p11 = scmp.lt.s32.totalorder %s186_s5, %s651_s30 }
  0x33   : > { %p648_p8 = pnand %p646_p7, %p634_p5  ;;  %p654_p13 = scmp.lt.s32.totalorder %s652_s8, %s645_s10 }
  0x35   : > { %p649_p10 = pneg %p648_p8  ;;  %p655_p3 = por %p654_p13, %p653_p11 }
  0x37   : > { %p656_p1 = pnand %p655_p3, %p649_p10 }
  0x39   : > { %659 = shalt.err (!%p656_p1)
}
  0x3a   : > { %540 = dma.hbm_to_vmem [thread:$0]  (!%p922_p2), %s183_s25, 64, %s186_s5, %s174_s9  }
  0x3b   : > { %s501_s4 = sshll.u32 %s772_s16, 7  ;;  %s196_s0 = scalar_lea.vmem [#allocation6], %s500_s7 }
  0x3c   : > { %s201_s28 = scalar_lea.hbm %s1013_s1, %s501_s4  ;;  %s203_s2 = sshll.u32 %s196_s0, 4  ;;  %s204_s2 = int_to_ptr.vmem [resolvable:$true] %s203_s2 }
  0x3d   : > { %s193_s20 = scalar_lea.sflag [#allocation7], %s192_s29  ;;  %s673_s27 = scalar_lea.vmem %s204_s2, 128 }
  0x3e   : > { %p674_p4 = scmp.ne.s32.totalorder %s204_s2, %s673_s27  ;;  %s780_s10 = smov [#allocation6]  }
  0x3f   : > { %s678_s30 = sshll.u32 %s780_s10, 4  ;;  %s679_s30 = int_to_ptr.vmem [resolvable:$false] %s678_s30 }
  0x40   : > { %p676_p6 = pnand %p674_p4, %p634_p5  ;;  %s680_s8 = scalar_lea.vmem %s679_s30, 256 }
  0x41   : > { %p681_p12 = scmp.lt.s32.totalorder %s204_s2, %s679_s30  ;;  %p682_p0 = scmp.lt.s32.totalorder %s680_s8, %s673_s27 }
  0x42   : > { %p677_p9 = pneg %p676_p6 }
  0x43   : > { %p683_p7 = por %p682_p0, %p681_p12 }
  0x45   : > { %p684_p8 = pnand %p683_p7, %p677_p9 }
  0x47   : > { %687 = shalt.err (!%p684_p8)
}
  0x48   : > { %543 = dma.hbm_to_vmem [thread:$0]  (!%p922_p2), %s201_s28, 128, %s204_s2, %s193_s20  }
  0x49   : > { %p1034_p10 = scmp.ne.s32.totalorder %s1026_s24, 0 }
  0x4a   : > { %s948_s0 = sand.u32 (!%p1034_p10), 1, %s760_s13   ;;  %p1035_p5 = scmp.ne.s32.totalorder (!%p1034_p10), %s1023_s21, 0 }
  0x4b   : > { %212 = sbr.rel (%p1034_p10) target bundleno = 411 (0x19b), region = 32  ;;  %s503_s25 = sshll.u32 (!%p1034_p10), %s948_s0, 2 }
  0x4c   : > { %s215_s5 = scalar_lea.sflag (!%p1034_p10), [#allocation4], %s948_s0  ;;  %s218_s27 = scalar_lea.vmem (!%p1034_p10), [#allocation3], %s503_s25 }
  0x50   : > { %739 = dma.done.wait (%p1035_p5), %s215_s5, 64  }
  0x51   : > { %741 = vsyncadd (%p1035_p5), %s215_s5, 4294967232  ;;  %s223_s2 = sand.u32 1, %s836_s18   ;;  %s504_s24 = sshll.u32 %s948_s0, 3 }
  0x52   : > { %s224_s26 = scalar_lea.sflag [#allocation7], %s223_s2  ;;  %s227_s29 = scalar_lea.vmem [#allocation6], %s504_s24 }
  0x53   : > { %743 = dma.done.wait (%p1035_p5), %s224_s26, 128  }
  0x54   : > { %745 = vsyncadd (%p1035_p5), %s224_s26, 4294967168  ;;  %p1036_p2 = scmp.eq.s32.totalorder %s836_s18, 0 }
  0x56   : > { %747 = dma.done.wait (%p1036_p2), [#allocation7], 128   ;;  %p1037_p11 = pmov %p1036_p2 }
  0x57   : > { %v781_v0 = vmov 1.0   ;;  %v782_v1 = vmov 0.0   ;;  %vm783_vm0 = vmmov 0   ;;  %vm344_vm1 = vcmask 1043456   ;;  %v259_v2 = vld [vmem:[%s227_s29] sm:$0xff]  ;;  %v262_v6 = vld [vmem:[#allocation8] sm:$0xff] }
  0x58   : > { %749 = vsyncadd (%p1037_p11), [#allocation7], 4294967168  ;;  %261 = vst [vmem:[#allocation2 + $0x8] sm:$0x1] %v781_v0  ;;  %516 = vmatprep.subr.mxu0 %v782_v1  ;;  %520 = vmatprep.mubr.msk.f32.mxu0 %vm783_vm0, %v782_v1  ;;  %vm269_vm2 = vcmask 1040384   ;;  %vm265_vm3 = vcmask 72704  }
  0x59   : > { %v343_v3 = vld [vmem:[%s218_s27] sm:$0xf]  ;;  %s510_s18 = sshll.u32 %s768_s15, 6  ;;  %s258_s21 = scalar_lea.vmem [#allocation9], %s503_s25 }
  0x5a   : > { %v345_v4 = vsel %vm344_vm1, %v343_v3, 0.0  ;;  %s379_s7 = sshll.u32 %s258_s21, 4  ;;  %s377_s11 = scalar_lea.hbm %s1015_s3, %s510_s18  ;;  %s380_s7 = int_to_ptr.vmem [resolvable:$true] %s379_s7 }
  0x5b   : > { %346 = vadd.xlane.f32.xlu0 %v345_v4  ;;  %s365_s19 = scalar_lea.sflag [#allocation5], %s948_s0  ;;  %s688_s28 = scalar_lea.vmem %s380_s7, 64 }
  0x5c   : > { %p689_p13 = scmp.ne.s32.totalorder %s380_s7, %s688_s28  ;;  %p1038_p3 = scmp.ne.s32.totalorder %s1024_s22, 0 }
  0x5d   : > { %s784_s20 = smov [#allocation9]  }
  0x5e   : > { %p690_p1 = pnand %p689_p13, %p1038_p3  ;;  %s692_s10 = sshll.u32 %s784_s20, 4  ;;  %s693_s10 = int_to_ptr.vmem [resolvable:$false] %s692_s10 }
  0x5f   : > { %v264_v5 = vld [vmem:[#allocation2 + $0x8] sm:$0x1]  ;;  %s694_s15 = scalar_lea.vmem %s693_s10, 128  ;;  %p695_p6 = scmp.lt.s32.totalorder %s380_s7, %s693_s10 }
  0x60   : > { %517 = vmatpush3.msk.msra.mxu0 %vm269_vm2, %v264_v5  ;;  %p691_p4 = pneg %p690_p1  ;;  %p696_p9 = scmp.lt.s32.totalorder %s694_s15, %s688_s28 }
  0x61   : > { %518 = vmatprep.subr.mxu0 %v782_v1 }
  0x62   : > { %519 = vmatpush3.msra.mxu0 %v259_v2  ;;  %p697_p12 = por %p696_p9, %p695_p6 }
  0x63   : > { %521 = vmatmul.mubr.msk.f32.vlgmr.msra.gmra.mxu0 %vm265_vm3, %v262_v6 }
  0x64   : > { %p698_p0 = pnand %p697_p12, %p691_p4 }
  0xe4   : > { %v347_v7 = vpop.xlane.xlu0 %346 }
  0xe5   : > { %v348_v8 = vmul.f32 0.0078125, %v347_v7 }
  0xe7   : > { %v349_v9 = vsub.f32 %v343_v3, %v348_v8 }
  0xe9   : > { %v350_v10 = vmul.f32 %v349_v9, %v349_v9 }
  0xeb   : > { %v351_v11 = vsel %vm344_vm1, %v350_v10, 0.0 }
  0xec   : > { %352 = vadd.xlane.f32.xlu0 %v351_v11 }
 0x123   : > { %v339_v12 = vpop.f32.mrf.mxu0 }
 0x124   : > { %v360_v19 = vrot.slane %v339_v12, 4 }
 0x125   : > { %v522_v13 = vpop.f32.mrf.mxu0 }
 0x175   : > { %v353_v14 = vpop.xlane.xlu0 %352 }
 0x176   : > { %v354_v15 = vmul.f32 0.0078125, %v353_v14 }
 0x178   : > { %v355_v16 = vadd.f32 1e-05, %v354_v15 }
 0x17a   : > { %604 = vrsqrt.f32 %v355_v16 }
 0x187   : > { %v605_v17 = vpop.eup %604 }
 0x188   : > { %v357_v18 = vmul.f32 %v605_v17, %v349_v9 }
 0x18a   : > { %v358_v20 = vmul.f32 %v357_v18, %v339_v12 }
 0x18c   : > { %v362_v21 = vadd.f32 %v360_v19, %v358_v20 }
 0x18e   : > { %363 = vst [vmem:[%s258_s21] sm:$0xf] %v362_v21 }
 0x18f   : > { %701 = shalt.err (!%p698_p0)
}
 0x190   : > { %s702_s30 = scalar_lea.hbm %s377_s11, 64  ;;  %s706_s25 = scalar_lea.hbm %s1015_s3, 128 }
 0x191   : > { %p703_p7 = scmp.ne.s32.totalorder %s377_s11, %s702_s30  ;;  %p707_p5 = scmp.lt.s32.totalorder %s377_s11, %s1015_s3 }
 0x192   : > { %p708_p2 = scmp.lt.s32.totalorder %s706_s25, %s702_s30 }
 0x193   : > { %p704_p8 = pnand %p703_p7, %p1038_p3 }
 0x194   : > { %p709_p11 = por %p708_p2, %p707_p5 }
 0x195   : > { %p705_p10 = pneg %p704_p8 }
 0x197   : > { %p710_p13 = pnand %p709_p11, %p705_p10 }
 0x199   : > { %713 = shalt.err (!%p710_p13)
}
 0x19a   : > { %531 = dma.vmem_to_hbm [thread:$0]  (%p1038_p3), %s380_s7, 64, %s377_s11, %s365_s19  }
 0x19b PF: > { %s391_s2 = sand.u32 1, %s756_s12   ;;  %p1039_p1 = scmp.ne.s32.totalorder %s1025_s23, 0 }
 0x19c   : > { %p1040_p4 = scmp.ge.s32.totalorder %s776_s17, 2  ;;  %s392_s24 = scalar_lea.sflag [#allocation5], %s391_s2 }
 0x19e   : > { %p545_p6 = pnand %p1040_p4, %p1039_p1 }
 0x1a0   : > { %p546_p9 = pneg %p545_p6 }
 0x1a2   : > { %751 = dma.done.wait (%p546_p9), %s392_s24, 64  }
 0x1a3   : > { %753 = vsyncadd (%p546_p9), %s392_s24, 4294967232  ;;  %s22_s17 = sadd.s32 1, %s776_s17   ;;  %s1041_s22 = sld [smem:[#allocation14_spill]] }
 0x1a4   : > { %p19_p12 = scmp.ge.s32.totalorder %s22_s17, 4   ;;  %s1042_s12 = smov %s760_s13 }
 0x1a5   : > { %s1043_s13 = smov %s764_s14  ;;  %s1044_s14 = smov %s916_s6 }
 0x1a6   : > { %s1045_s15 = smov %s772_s16  ;;  %21 = sbr.rel (!%p19_p12) target bundleno = 11 (0xb), region = 95 }
 0x1a9   : > { %s1046_s16 = smov %s1041_s22 }
 0x1ab   :  { %397 = vsyncpa [#allocation4], 1 }
 0x1ac   :  { %399 = vsyncpa [#allocation4 + $0x1], 1 }
 0x1ad   :  { %400 = vsyncpa [#allocation7], 1 }
 0x1ae   :  { %402 = vsyncpa [#allocation7 + $0x1], 1 }
 0x1af   :  { %403 = vsyncpa [#allocation5], 1 }
 0x1b0   :  { %405 = vsyncpa [#allocation5 + $0x1], 1 }

</bundles_post_ra>
